<compile_context>
chip_gen: v5e
topology: v5e:2x2
jax: 0.10.0
libtpu: 0.0.40
codegen_flags: <defaults>
</compile_context>

<pallas_src>
import re
from functools import partial

import numpy as np
import jax
import jax.numpy as jnp
from jax.experimental import pallas as pl
from jax.experimental.pallas import tpu as pltpu

LANE = 128        # TPU lane width; every feature dim is zero-padded to this
SUBLANE = 8       # minimum row tile
MAX_TB = 512      # rows per grid step for large batches


# ----------------------------- Frame glue (host-side string preprocessing) --

def _f(tok: str) -> int:
    if tok == 'NOP':
        return 1
    elif tok == 'LHLD':
        return 2
    elif tok == 'SHLD':
        return 3
    else:
        return -1


def _filter(program: str):
    return re.findall(r'\b[A-Z]+\b', program)


def program2numbers(program: str):
    toks = _filter(program)
    return [_f(t) for t in toks[:-1]]


def _bucket(b: int) -> int:
    """Power-of-2 batch bucket (>= SUBLANE) to avoid per-size recompiles."""
    p = SUBLANE
    while p < b:
        p *= 2
    return p


def programs2batch_np(programs, N: int):
    """Host-side (numpy) batch construction, zero-padded to (B_pad, LANE)."""
    B = len(programs)
    B_pad = _bucket(B)
    out = np.zeros((B_pad, LANE), dtype=np.float32)
    for i, p in enumerate(programs):
        nums = program2numbers(p)
        assert len(nums) <= N, "program longer than N (matches torch.zeros(N) assignment error)"
        if nums:
            out[i, :len(nums)] = np.asarray(nums, dtype=np.float32)
    return out, B


# ----------------------------- Pallas kernel --------------------------------

def mlp_kernel(x_ref, w_ref, b_ref, out_ref):
    # 5-layer MLP on zero-padded 128-lane tiles.
    # x_ref: (TB, 128) bf16   w_ref: (5, 128, 128) bf16
    # b_ref: (8, 128) f32 (rows 0..4 used)   out_ref: (TB, 128) f32
    x = x_ref[...]
    # linear1 (no activation afterwards, matching the PyTorch forward)
    h = jnp.dot(x, w_ref[0], preferred_element_type=jnp.float32) + b_ref[0]
    # linear2 + ReLU
    h = jnp.dot(h.astype(jnp.bfloat16), w_ref[1],
                preferred_element_type=jnp.float32) + b_ref[1]
    h = jnp.maximum(h, 0.0)
    # linear3 + ReLU
    h = jnp.dot(h.astype(jnp.bfloat16), w_ref[2],
                preferred_element_type=jnp.float32) + b_ref[2]
    h = jnp.maximum(h, 0.0)
    # linear4 + ReLU
    h = jnp.dot(h.astype(jnp.bfloat16), w_ref[3],
                preferred_element_type=jnp.float32) + b_ref[3]
    h = jnp.maximum(h, 0.0)
    # linear5 -> logits (padded to 128 lanes; columns >= N+3 are exactly zero
    # up to bf16 rounding of the zero pad, i.e. exactly zero)
    out_ref[...] = jnp.dot(h.astype(jnp.bfloat16), w_ref[4],
                           preferred_element_type=jnp.float32) + b_ref[4]


def policy_logits_padded(x_pad_bf16, w_pack, b_pack):
    """x_pad_bf16: (B_pad, 128) bf16; returns (B_pad, 128) f32 padded logits."""
    B_pad = x_pad_bf16.shape[0]
    TB = min(B_pad, MAX_TB)          # B_pad is a power of 2 >= 8, so TB | B_pad
    grid = (B_pad // TB,)
    return pl.pallas_call(
        mlp_kernel,
        out_shape=jax.ShapeDtypeStruct((B_pad, LANE), jnp.float32),
        grid=grid,
        in_specs=[
            pl.BlockSpec((TB, LANE), lambda i: (i, 0)),          # x row tile
            pl.BlockSpec((5, LANE, LANE), lambda i: (0, 0, 0)),  # weights, VMEM-resident
            pl.BlockSpec((SUBLANE, LANE), lambda i: (0, 0)),     # biases, VMEM-resident
        ],
        out_specs=pl.BlockSpec((TB, LANE), lambda i: (i, 0)),
        compiler_params=pltpu.CompilerParams(
            dimension_semantics=("parallel",)),                  # 2 TCs on v7x
    )(x_pad_bf16, w_pack, b_pack)


@partial(jax.jit, static_argnames=("out_dim",))
def policy_step(x_pad, w_pack, b_pack, key, out_dim):
    """One fused device step: Pallas MLP + categorical sampling (all rows)."""
    logits_pad = policy_logits_padded(x_pad.astype(jnp.bfloat16), w_pack, b_pack)
    logits = logits_pad[:, :out_dim]                     # (B_pad, N+3)
    k1, k2 = jax.random.split(key)
    line2change = jax.random.categorical(k1, logits[:, :-3], axis=1)  # (B_pad,)
    change = jax.random.categorical(k2, logits[:, -3:], axis=1)       # (B_pad,)
    return line2change, change, logits


# ----------------------------- Parameter init / packing ---------------------

def init_linear(key, fan_in, fan_out):
    # Mimics nn.Linear default init: U(-1/sqrt(fan_in), +1/sqrt(fan_in)).
    kw, kb = jax.random.split(key)
    bound = 1.0 / float(np.sqrt(fan_in))
    w = jax.random.uniform(kw, (fan_in, fan_out), jnp.float32, -bound, bound)
    b = jax.random.uniform(kb, (fan_out,), jnp.float32, -bound, bound)
    return w, b


def init_policy_params(key, N):
    keys = jax.random.split(key, 5)
    dims = [(N, 128), (128, 64), (64, 64), (64, 64), (64, N + 3)]
    ws, bs = [], []
    for k, (fi, fo) in zip(keys, dims):
        w, b = init_linear(k, fi, fo)
        ws.append(w)
        bs.append(b)
    return ws, bs


def pack_policy_params(ws, bs):
    """Zero-pad each layer to 128 lanes: weights -> (5,128,128) bf16,
    biases -> one (8,128) f32 tile (rows 0..4)."""
    W = np.zeros((5, LANE, LANE), dtype=np.float32)
    Bv = np.zeros((SUBLANE, LANE), dtype=np.float32)
    for i, (w, b) in enumerate(zip(ws, bs)):
        w = np.asarray(w, dtype=np.float32)
        b = np.asarray(b, dtype=np.float32)
        W[i, :w.shape[0], :w.shape[1]] = w
        Bv[i, :b.shape[0]] = b
    return jnp.asarray(W, dtype=jnp.bfloat16), jnp.asarray(Bv, dtype=jnp.float32)


# ----------------------------- Policy forward -------------------------------

def policy_forward(x, w_pack, b_pack, N, sample_key, logit=False):
    """x: str or list[str]; reproduces Policy.forward semantics."""
    programs = [x] if isinstance(x, str) else list(x)
    x_np, B = programs2batch_np(programs, N)              # host-side numpy build
    line, change, logits = policy_step(jnp.asarray(x_np), w_pack, b_pack,
                                       sample_key, out_dim=N + 3)
    # drop padded rows on the host (no recompile per batch size)
    action = {'line': line[:B], 'change': change[:B]}
    if logit:
        return action, logits[:B]
    return action


# ----------------------------- Main ------------------------------------------

if __name__ == "__main__":
    N = 16
    key = jax.random.PRNGKey(0)
    pkey, skey = jax.random.split(key)
    ws, bs = init_policy_params(pkey, N)
    w_pack, b_pack = pack_policy_params(ws, bs)

    programs = [
        "NOP 7e87e8\nLHLD 7e87e8\nSHLD 7e87e8\nHLT",
        "LHLD 7e87e8\nNOP 7e87e8\nNOP 7e87e8\nSHLD 7e87e8\nHLT",
    ]

    action, logits = policy_forward(programs, w_pack, b_pack, N, skey, logit=True)
    jax.block_until_ready(logits)
    jax.block_until_ready(action['line'])
    jax.block_until_ready(action['change'])

    # also exercise the single-string path (same compiled executable: B_pad=8)
    action1 = policy_forward(programs[0], w_pack, b_pack, N, skey, logit=False)
    jax.block_until_ready(action1['line'])

    # ---- reference checks ----------------------------------------------------
    x_np, B = programs2batch_np(programs, N)
    x = jnp.asarray(x_np[:B, :N])                         # (B, N) unpadded input

    def mm_bf16(a, w):
        return jnp.dot(a.astype(jnp.bfloat16), jnp.asarray(w, jnp.bfloat16),
                       preferred_element_type=jnp.float32)

    # reference mimicking the kernel's bf16-input / f32-accumulate scheme
    h = mm_bf16(x, ws[0]) + bs[0]
    h = jnp.maximum(mm_bf16(h, ws[1]) + bs[1], 0)
    h = jnp.maximum(mm_bf16(h, ws[2]) + bs[2], 0)
    h = jnp.maximum(mm_bf16(h, ws[3]) + bs[3], 0)
    ref_bf16 = mm_bf16(h, ws[4]) + bs[4]

    # pure-f32 reference (looser tolerance: bf16 weight storage)
    h = x @ ws[0] + bs[0]
    h = jnp.maximum(h @ ws[1] + bs[1], 0)
    h = jnp.maximum(h @ ws[2] + bs[2], 0)
    h = jnp.maximum(h @ ws[3] + bs[3], 0)
    ref_f32 = h @ ws[4] + bs[4]

    assert logits.shape == (2, N + 3)
    assert action['line'].shape == (2,) and action['change'].shape == (2,)
    assert action1['line'].shape == (1,) and action1['change'].shape == (1,)
    assert bool(jnp.all(action['line'] >= 0)) and bool(jnp.all(action['line'] < N))
    assert bool(jnp.all(action['change'] >= 0)) and bool(jnp.all(action['change'] < 3))
    assert jnp.allclose(logits, ref_bf16, atol=5e-3, rtol=5e-3)
    assert jnp.allclose(logits, ref_f32, atol=5e-2, rtol=5e-2)

    print("KERNEL_OK")
</pallas_src>

<mosaic_0001>
module attributes {stable_mosaic.version = 11 : i64} {
  func.func @mlp_kernel(%arg0: i32, %arg1: memref<8x128xbf16, #tpu.memory_space<vmem>>, %arg2: memref<5x128x128xbf16, #tpu.memory_space<vmem>>, %arg3: memref<8x128xf32, #tpu.memory_space<vmem>>, %arg4: memref<8x128xf32, #tpu.memory_space<vmem>>) attributes {dimension_semantics = [#tpu.dimension_semantics<parallel>], iteration_bounds = array<i64: 1>, scalar_prefetch = 0 : i64, scratch_operands = 0 : i64, tpu.core_type = #tpu.core_type<tc>, window_params = [{transform_indices = @transform_0, window_bounds = array<i64: 8, 128>}, {pipeline_mode = #tpu.pipeline_mode<synchronous>, transform_indices = @transform_1, window_bounds = array<i64: 5, 128, 128>}, {pipeline_mode = #tpu.pipeline_mode<synchronous>, transform_indices = @transform_2, window_bounds = array<i64: 8, 128>}, {transform_indices = @transform_3, window_bounds = array<i64: 8, 128>}]} {
    %c0 = arith.constant 0 : index
    %c0_0 = arith.constant 0 : index
    %0 = vector.load %arg1[%c0, %c0_0] : memref<8x128xbf16, #tpu.memory_space<vmem>>, vector<8x128xbf16>
    %c0_1 = arith.constant 0 : index
    %c0_2 = arith.constant 0 : index
    %c0_3 = arith.constant 0 : index
    %1 = vector.load %arg2[%c0_1, %c0_2, %c0_3] : memref<5x128x128xbf16, #tpu.memory_space<vmem>>, vector<1x128x128xbf16>
    %2 = vector.shape_cast %1 : vector<1x128x128xbf16> to vector<128x128xbf16>
    %cst = arith.constant dense<0.000000e+00> : vector<8x128xf32>
    %3 = tpu.matmul %0, %2, %cst {dimension_numbers = #tpu.dot_dimension_numbers<[1], [0], [0], [1], [0, 0, 1, 1], [], []>} : vector<8x128xbf16>, vector<128x128xbf16>, vector<8x128xf32> -> vector<8x128xf32>
    %c0_4 = arith.constant 0 : index
    %c0_5 = arith.constant 0 : index
    %4 = vector.load %arg3[%c0_4, %c0_5] : memref<8x128xf32, #tpu.memory_space<vmem>>, vector<1x128xf32>
    %5 = vector.shape_cast %4 : vector<1x128xf32> to vector<128xf32>
    %6 = vector.shape_cast %5 : vector<128xf32> to vector<1x128xf32>
    %7 = vector.broadcast %6 : vector<1x128xf32> to vector<8x128xf32>
    %8 = arith.addf %3, %7 : vector<8x128xf32>
    %9 = arith.truncf %8 : vector<8x128xf32> to vector<8x128xbf16>
    %c1 = arith.constant 1 : index
    %c0_6 = arith.constant 0 : index
    %c0_7 = arith.constant 0 : index
    %10 = vector.load %arg2[%c1, %c0_6, %c0_7] : memref<5x128x128xbf16, #tpu.memory_space<vmem>>, vector<1x128x128xbf16>
    %11 = vector.shape_cast %10 : vector<1x128x128xbf16> to vector<128x128xbf16>
    %cst_8 = arith.constant dense<0.000000e+00> : vector<8x128xf32>
    %12 = tpu.matmul %9, %11, %cst_8 {dimension_numbers = #tpu.dot_dimension_numbers<[1], [0], [0], [1], [0, 0, 1, 1], [], []>} : vector<8x128xbf16>, vector<128x128xbf16>, vector<8x128xf32> -> vector<8x128xf32>
    %c1_9 = arith.constant 1 : index
    %c0_10 = arith.constant 0 : index
    %13 = vector.load %arg3[%c1_9, %c0_10] : memref<8x128xf32, #tpu.memory_space<vmem>>, vector<1x128xf32>
    %14 = vector.shape_cast %13 : vector<1x128xf32> to vector<128xf32>
    %15 = vector.shape_cast %14 : vector<128xf32> to vector<1x128xf32>
    %16 = vector.broadcast %15 : vector<1x128xf32> to vector<8x128xf32>
    %17 = arith.addf %12, %16 : vector<8x128xf32>
    %cst_11 = arith.constant 0.000000e+00 : f32
    %18 = vector.broadcast %cst_11 : f32 to vector<8x128xf32>
    %19 = arith.maximumf %17, %18 : vector<8x128xf32>
    %20 = arith.truncf %19 : vector<8x128xf32> to vector<8x128xbf16>
    %c2 = arith.constant 2 : index
    %c0_12 = arith.constant 0 : index
    %c0_13 = arith.constant 0 : index
    %21 = vector.load %arg2[%c2, %c0_12, %c0_13] : memref<5x128x128xbf16, #tpu.memory_space<vmem>>, vector<1x128x128xbf16>
    %22 = vector.shape_cast %21 : vector<1x128x128xbf16> to vector<128x128xbf16>
    %cst_14 = arith.constant dense<0.000000e+00> : vector<8x128xf32>
    %23 = tpu.matmul %20, %22, %cst_14 {dimension_numbers = #tpu.dot_dimension_numbers<[1], [0], [0], [1], [0, 0, 1, 1], [], []>} : vector<8x128xbf16>, vector<128x128xbf16>, vector<8x128xf32> -> vector<8x128xf32>
    %c2_15 = arith.constant 2 : index
    %c0_16 = arith.constant 0 : index
    %24 = vector.load %arg3[%c2_15, %c0_16] : memref<8x128xf32, #tpu.memory_space<vmem>>, vector<1x128xf32>
    %25 = vector.shape_cast %24 : vector<1x128xf32> to vector<128xf32>
    %26 = vector.shape_cast %25 : vector<128xf32> to vector<1x128xf32>
    %27 = vector.broadcast %26 : vector<1x128xf32> to vector<8x128xf32>
    %28 = arith.addf %23, %27 : vector<8x128xf32>
    %cst_17 = arith.constant 0.000000e+00 : f32
    %29 = vector.broadcast %cst_17 : f32 to vector<8x128xf32>
    %30 = arith.maximumf %28, %29 : vector<8x128xf32>
    %31 = arith.truncf %30 : vector<8x128xf32> to vector<8x128xbf16>
    %c3 = arith.constant 3 : index
    %c0_18 = arith.constant 0 : index
    %c0_19 = arith.constant 0 : index
    %32 = vector.load %arg2[%c3, %c0_18, %c0_19] : memref<5x128x128xbf16, #tpu.memory_space<vmem>>, vector<1x128x128xbf16>
    %33 = vector.shape_cast %32 : vector<1x128x128xbf16> to vector<128x128xbf16>
    %cst_20 = arith.constant dense<0.000000e+00> : vector<8x128xf32>
    %34 = tpu.matmul %31, %33, %cst_20 {dimension_numbers = #tpu.dot_dimension_numbers<[1], [0], [0], [1], [0, 0, 1, 1], [], []>} : vector<8x128xbf16>, vector<128x128xbf16>, vector<8x128xf32> -> vector<8x128xf32>
    %c3_21 = arith.constant 3 : index
    %c0_22 = arith.constant 0 : index
    %35 = vector.load %arg3[%c3_21, %c0_22] : memref<8x128xf32, #tpu.memory_space<vmem>>, vector<1x128xf32>
    %36 = vector.shape_cast %35 : vector<1x128xf32> to vector<128xf32>
    %37 = vector.shape_cast %36 : vector<128xf32> to vector<1x128xf32>
    %38 = vector.broadcast %37 : vector<1x128xf32> to vector<8x128xf32>
    %39 = arith.addf %34, %38 : vector<8x128xf32>
    %cst_23 = arith.constant 0.000000e+00 : f32
    %40 = vector.broadcast %cst_23 : f32 to vector<8x128xf32>
    %41 = arith.maximumf %39, %40 : vector<8x128xf32>
    %42 = arith.truncf %41 : vector<8x128xf32> to vector<8x128xbf16>
    %c4 = arith.constant 4 : index
    %c0_24 = arith.constant 0 : index
    %c0_25 = arith.constant 0 : index
    %43 = vector.load %arg2[%c4, %c0_24, %c0_25] : memref<5x128x128xbf16, #tpu.memory_space<vmem>>, vector<1x128x128xbf16>
    %44 = vector.shape_cast %43 : vector<1x128x128xbf16> to vector<128x128xbf16>
    %cst_26 = arith.constant dense<0.000000e+00> : vector<8x128xf32>
    %45 = tpu.matmul %42, %44, %cst_26 {dimension_numbers = #tpu.dot_dimension_numbers<[1], [0], [0], [1], [0, 0, 1, 1], [], []>} : vector<8x128xbf16>, vector<128x128xbf16>, vector<8x128xf32> -> vector<8x128xf32>
    %c4_27 = arith.constant 4 : index
    %c0_28 = arith.constant 0 : index
    %46 = vector.load %arg3[%c4_27, %c0_28] : memref<8x128xf32, #tpu.memory_space<vmem>>, vector<1x128xf32>
    %47 = vector.shape_cast %46 : vector<1x128xf32> to vector<128xf32>
    %48 = vector.shape_cast %47 : vector<128xf32> to vector<1x128xf32>
    %49 = vector.broadcast %48 : vector<1x128xf32> to vector<8x128xf32>
    %50 = arith.addf %45, %49 : vector<8x128xf32>
    %c0_29 = arith.constant 0 : index
    %c0_30 = arith.constant 0 : index
    %51 = vector.load %arg4[%c0_29, %c0_30] : memref<8x128xf32, #tpu.memory_space<vmem>>, vector<8x128xf32>
    tpu.vector_store %arg4[%c0_29, %c0_30], %50 {strides = array<i32>} : memref<8x128xf32, #tpu.memory_space<vmem>>, vector<8x128xf32>,
    return
  }
  func.func @transform_0(%arg0: i32) -> (i32, i32) {
    %c0_i32 = arith.constant 0 : i32
    %c0_i32_0 = arith.constant 0 : i32
    return %arg0, %c0_i32 : i32, i32
  }
  func.func @transform_1(%arg0: i32) -> (i32, i32, i32) {
    %c0_i32 = arith.constant 0 : i32
    %c0_i32_0 = arith.constant 0 : i32
    %c0_i32_1 = arith.constant 0 : i32
    %c0_i32_2 = arith.constant 0 : i32
    return %c0_i32, %c0_i32_0, %c0_i32_1 : i32, i32, i32
  }
  func.func @transform_2(%arg0: i32) -> (i32, i32) {
    %c0_i32 = arith.constant 0 : i32
    %c0_i32_0 = arith.constant 0 : i32
    %c0_i32_1 = arith.constant 0 : i32
    return %c0_i32, %c0_i32_0 : i32, i32
  }
  func.func @transform_3(%arg0: i32) -> (i32, i32) {
    %c0_i32 = arith.constant 0 : i32
    %c0_i32_0 = arith.constant 0 : i32
    return %arg0, %c0_i32 : i32, i32
  }
}

</mosaic_0001>

<bundles_post_ra>
// kernel: policy_step.3
= control target key start
LH: loop header
LB: loop body
LE: loop exit
PB: predicated region body
PF: predicated region fallthrough
CT: control target
= control target key end

     0   :  { %8 = vsyncpa [#allocation3], 0  ;;  %s677_s15 = smov [#allocation2]   ;;  %s678_s17 = smov 64   ;;  %s724_s0 = inlined_call_operand.vmem [shape: bf16[8,128], index: 0, kind: input, shape index: {}]   ;;  %s725_s1 = inlined_call_operand.hbm [shape: bf16[5,128,128], index: 1, kind: input, shape index: {}]   ;;  %s726_s2 = inlined_call_operand.vmem [shape: f32[8,128], index: 2, kind: input, shape index: {}]   ;;  %s727_s3 = inlined_call_operand.vmem [shape: f32[8,128], index: 3, kind: output, shape index: {}]  }
   0x1   :  { %s15_s14 = sshll.u32 %s725_s1, 4  ;;  %s17_s16 = sshll.u32 %s677_s15, 4  ;;  %s16_s14 = int_to_ptr.hbm [resolvable:$true] %s15_s14  ;;  %s18_s16 = int_to_ptr.vmem [resolvable:$true] %s17_s16 }
   0x2   :  { %s679_s18 = smov 4  }
   0x3   :  { %23 = dma.hbm_to_vmem [thread:$0]  %s16_s14, 5120, %s18_s16, [#allocation3], %s678_s17, %s678_s17, %s679_s18  }
   0x4   :  { %675 = dma.done.wait [#allocation3], 5120  }
   0x5   :  { %676 = vsyncadd [#allocation3], 4294962176  ;;  %v610_v0 = vld [vmem:[#allocation2 + $0x38] sm:$0xff]  ;;  %v609_v1 = vld [vmem:[#allocation2 + $0x30] sm:$0xff] }
   0x6   :  { %97 = vmatpush.bf16.msra.mxu0 %v610_v0  ;;  %v618_v2 = vld [vmem:[#allocation2 + $0x78] sm:$0xff]  ;;  %v608_v3 = vld [vmem:[#allocation2 + $0x28] sm:$0xff]  ;;  %v617_v4 = vld [vmem:[#allocation2 + $0x70] sm:$0xff] }
   0x7   :  { %178 = vmatpush.bf16.msra.mxu1 %v618_v2  ;;  %v616_v5 = vld [vmem:[#allocation2 + $0x68] sm:$0xff]  ;;  %v607_v6 = vld [vmem:[#allocation2 + $0x20] sm:$0xff]  ;;  %v606_v8 = vld [vmem:[#allocation2 + $0x18] sm:$0xff] }
   0x8   :  { %v615_v7 = vld [vmem:[#allocation2 + $0x60] sm:$0xff]  ;;  %v614_v9 = vld [vmem:[#allocation2 + $0x58] sm:$0xff]  ;;  %v605_v10 = vld [vmem:[#allocation2 + $0x10] sm:$0xff] }
   0x9   :  { %v613_v11 = vld [vmem:[#allocation2 + $0x50] sm:$0xff]  ;;  %v604_v12 = vld [vmem:[#allocation2 + $0x8] sm:$0xff]  ;;  %v603_v14 = vld [vmem:[#allocation2] sm:$0xff] }
   0xa   :  { %98 = vmatpush.bf16.msra.mxu0 %v609_v1  ;;  %v612_v13 = vld [vmem:[#allocation2 + $0x48] sm:$0xff]  ;;  %v30_v15 = vld [vmem:[%s724_s0] sm:$0xf]  ;;  %v626_v17 = vld [vmem:[#allocation2 + $0xb8] sm:$0xff] }
   0xb   :  { %179 = vmatpush.bf16.msra.mxu1 %v617_v4  ;;  %v611_v16 = vld [vmem:[#allocation2 + $0x40] sm:$0xff]  ;;  %260 = vmatpush.bf16.msra.mxu2 %v626_v17  ;;  %v625_v18 = vld [vmem:[#allocation2 + $0xb0] sm:$0xff]  ;;  %v624_v19 = vld [vmem:[#allocation2 + $0xa8] sm:$0xff] }
   0xc   :  { %v623_v20 = vld [vmem:[#allocation2 + $0xa0] sm:$0xff]  ;;  %v622_v21 = vld [vmem:[#allocation2 + $0x98] sm:$0xff]  ;;  %v621_v22 = vld [vmem:[#allocation2 + $0x90] sm:$0xff] }
   0xd   :  { %v646_v23 = vld [vmem:[%s726_s2] ss:$0 sm:$0xff]  ;;  %v620_v28 = vld [vmem:[#allocation2 + $0x88] sm:$0xff]  ;;  %v634_v30 = vld [vmem:[#allocation2 + $0xf8] sm:$0xff] }
   0xe   :  { %99 = vmatpush.bf16.msra.mxu0 %v608_v3  ;;  %v619_v29 = vld [vmem:[#allocation2 + $0x80] sm:$0xff]  ;;  %342 = vmatpush.bf16.msra.mxu3 %v634_v30  ;;  %v633_v31 = vld [vmem:[#allocation2 + $0xf0] sm:$0xff]  ;;  %v632_v32 = vld [vmem:[#allocation2 + $0xe8] sm:$0xff] }
   0xf   :  { %180 = vmatpush.bf16.msra.mxu1 %v616_v5  ;;  %261 = vmatpush.bf16.msra.mxu2 %v625_v18  ;;  %v631_v33 = vld [vmem:[#allocation2 + $0xe0] sm:$0xff]  ;;  %v630_v34 = vld [vmem:[#allocation2 + $0xd8] sm:$0xff]  ;;  %v629_v35 = vld [vmem:[#allocation2 + $0xd0] sm:$0xff] }
  0x10   :  { %v647_v36 = vld [vmem:[%s726_s2 + $0x1] ss:$0 sm:$0xff]  ;;  %v628_v42 = vld [vmem:[#allocation2 + $0xc8] sm:$0xff]  ;;  %v642_v44 = vld [vmem:[#allocation2 + $0x138] sm:$0xff] }
  0x11   :  { %v627_v43 = vld [vmem:[#allocation2 + $0xc0] sm:$0xff]  ;;  %v641_v45 = vld [vmem:[#allocation2 + $0x130] sm:$0xff]  ;;  %v640_v46 = vld [vmem:[#allocation2 + $0x128] sm:$0xff] }
  0x12   :  { %100 = vmatpush.bf16.msra.mxu0 %v607_v6  ;;  %343 = vmatpush.bf16.msra.mxu3 %v633_v31  ;;  %v639_v47 = vld [vmem:[#allocation2 + $0x120] sm:$0xff]  ;;  %v638_v48 = vld [vmem:[#allocation2 + $0x118] sm:$0xff]  ;;  %v637_v49 = vld [vmem:[#allocation2 + $0x110] sm:$0xff] }
  0x13   :  { %181 = vmatpush.bf16.msra.mxu1 %v615_v7  ;;  %262 = vmatpush.bf16.msra.mxu2 %v624_v19  ;;  %v648_v50 = vld [vmem:[%s726_s2 + $0x2] ss:$0 sm:$0xff]  ;;  %v636_v56 = vld [vmem:[#allocation2 + $0x108] sm:$0xff]  ;;  %v649_v58 = vld [vmem:[%s726_s2 + $0x3] ss:$0 sm:$0xff] }
  0x14   :  { %v635_v57 = vld [vmem:[#allocation2 + $0x100] sm:$0xff] }
  0x15   :  { %v650_v0 = vld [vmem:[%s726_s2 + $0x4] ss:$0 sm:$0xff] }
  0x16   :  { %101 = vmatpush.bf16.msra.mxu0 %v606_v8  ;;  %344 = vmatpush.bf16.msra.mxu3 %v632_v32 }
  0x17   :  { %182 = vmatpush.bf16.msra.mxu1 %v614_v9  ;;  %263 = vmatpush.bf16.msra.mxu2 %v623_v20 }
  0x1a   :  { %102 = vmatpush.bf16.msra.mxu0 %v605_v10  ;;  %345 = vmatpush.bf16.msra.mxu3 %v631_v33 }
  0x1b   :  { %183 = vmatpush.bf16.msra.mxu1 %v613_v11  ;;  %264 = vmatpush.bf16.msra.mxu2 %v622_v21 }
  0x1e   :  { %103 = vmatpush.bf16.msra.mxu0 %v604_v12  ;;  %346 = vmatpush.bf16.msra.mxu3 %v630_v34 }
  0x1f   :  { %184 = vmatpush.bf16.msra.mxu1 %v612_v13  ;;  %265 = vmatpush.bf16.msra.mxu2 %v621_v22 }
  0x22   :  { %104 = vmatpush.bf16.msra.mxu0 %v603_v14  ;;  %347 = vmatpush.bf16.msra.mxu3 %v629_v35 }
  0x23   :  { %185 = vmatpush.bf16.msra.mxu1 %v611_v16  ;;  %266 = vmatpush.bf16.msra.mxu2 %v620_v28 }
  0x25   :  { %105 = vmatmul.bf16.vlgmr.msra.gmra.mxu0 %v30_v15 }
  0x26   :  { %348 = vmatpush.bf16.msra.mxu3 %v628_v42  ;;  %424 = vmatpush.bf16.msrb.mxu0 %v642_v44 }
  0x27   :  { %267 = vmatpush.bf16.msra.mxu2 %v619_v29 }
  0x2a   :  { %349 = vmatpush.bf16.msra.mxu3 %v627_v43  ;;  %425 = vmatpush.bf16.msrb.mxu0 %v641_v45 }
  0x2e   :  { %426 = vmatpush.bf16.msrb.mxu0 %v640_v46 }
  0x32   :  { %427 = vmatpush.bf16.msrb.mxu0 %v639_v47 }
  0x36   :  { %428 = vmatpush.bf16.msrb.mxu0 %v638_v48 }
  0x3a   :  { %429 = vmatpush.bf16.msrb.mxu0 %v637_v49 }
  0x3e   :  { %430 = vmatpush.bf16.msrb.mxu0 %v636_v56 }
  0x42   :  { %431 = vmatpush.bf16.msrb.mxu0 %v635_v57 }
  0xa2   :  { %v106_v24 = vpop.f32.mrf.mxu0 }
  0xa3   :  { %v107_v25 = vadd.f32 %v646_v23, %v106_v24 }
  0xa5   :  { %v110_v26 = vpack.c.bf16 %v107_v25, %v107_v25 }
  0xa7   :  { %186 = vmatmul.bf16.vlgmr.msra.gmra.mxu1 %v110_v26 }
  0xaa   :  { %v108_v27 = vpop.f32.mrf.mxu0 }
 0x124   :  { %v187_v37 = vpop.f32.mrf.mxu1 }
 0x125   :  { %v188_v38 = vadd.f32 %v647_v36, %v187_v37 }
 0x127   :  { %v191_v39 = vmax.f32 %v188_v38, 0.0 }
 0x129   :  { %v192_v40 = vpack.c.bf16 %v191_v39, %v191_v39 }
 0x12b   :  { %268 = vmatmul.bf16.vlgmr.msra.gmra.mxu2 %v192_v40 }
 0x12c   :  { %v189_v41 = vpop.f32.mrf.mxu1 }
 0x1ae   :  { %v269_v51 = vpop.f32.mrf.mxu2 }
 0x1af   :  { %v270_v52 = vadd.f32 %v648_v50, %v269_v51 }
 0x1b1   :  { %v273_v53 = vmax.f32 %v270_v52, 0.0 }
 0x1b3   :  { %v274_v54 = vpack.c.bf16 %v273_v53, %v273_v53 }
 0x1b5   :  { %350 = vmatmul.bf16.vlgmr.msra.gmra.mxu3 %v274_v54 }
 0x1b6   :  { %v271_v55 = vpop.f32.mrf.mxu2 }
 0x238   :  { %v351_v59 = vpop.f32.mrf.mxu3 }
 0x239   :  { %v352_v60 = vadd.f32 %v649_v58, %v351_v59 }
 0x23b   :  { %v355_v61 = vmax.f32 %v352_v60, 0.0 }
 0x23d   :  { %v356_v62 = vpack.c.bf16 %v355_v61, %v355_v61 }
 0x23f   :  { %432 = vmatmul.bf16.vlgmr.msrb.gmra.mxu0 %v356_v62 }
 0x240   :  { %v353_v63 = vpop.f32.mrf.mxu3 }
 0x2bc   :  { %v433_v1 = vpop.f32.mrf.mxu0 }
 0x2bd   :  { %v434_v2 = vadd.f32 %v650_v0, %v433_v1 }
 0x2bf   :  { %437 = vst [vmem:[%s727_s3] sm:$0xff] %v434_v2 }
 0x2c4   :  { %v435_v3 = vpop.f32.mrf.mxu0 }
 0x2c5   :  { %442 = vsyncpa [#allocation3], 1 }

</bundles_post_ra>
